<compile_context>
chip_gen: v7x
topology: tpu7x:2x2x1
jax: 0.10.0
libtpu: 0.0.40
codegen_flags: <defaults>
</compile_context>

<pallas_src>
import functools

import jax
import jax.numpy as jnp
from jax.experimental import pallas as pl
from jax.experimental.pallas import tpu as pltpu


def _resblock_kernel(x_ref, w1_ref, b1_ref, w2_ref, b2_ref, o_ref, pad_ref, *, width):
    # x_ref / o_ref : (rows, hw)        rows = Nb*C image*channel rows, hw = H*W lanes
    # w*_ref        : (9, rows, rows)   block-diagonal per-tap weight matrices
    # b*_ref        : (rows, 1)
    # pad_ref       : (rows, hw + 2*halo) zero-halo slab (flat-padded activation)
    rows, hw = x_ref.shape
    halo = width + 1                     # worst-case |flat shift| of a 3x3 tap
    pad_w = pad_ref.shape[1]             # = hw + 2*halo

    # Column masks for the kx=0 / kx=2 taps (row / ky padding is handled by the zero
    # halo lanes of the slab).  Computed once per grid step, reused by both convs.
    lane = jax.lax.broadcasted_iota(jnp.int32, (1, hw), 1)
    col = lane % width
    not_first_col = col != 0             # reading column w-1 is invalid at w == 0
    not_last_col = col != (width - 1)    # reading column w+1 is invalid at w == W-1

    # Zero only the halo lanes; the interior is overwritten by each conv's staging.
    pad_ref[:, 0:halo] = jnp.zeros((rows, halo), pad_ref.dtype)
    pad_ref[:, halo + hw:pad_w] = jnp.zeros((rows, pad_w - halo - hw), pad_ref.dtype)

    def conv3x3(v, w_ref):
        # One contiguous, lane-dense staging store of the activation into the slab.
        pad_ref[:, halo:halo + hw] = v
        acc = None
        for ky in range(3):
            for kx in range(3):
                shift = (ky - 1) * width + (kx - 1)
                # Contiguous lane-window load (vld side, not the scarce vst slot).
                s = pad_ref[:, halo + shift:halo + shift + hw]
                if kx == 0:
                    s = jnp.where(not_first_col, s, 0.0)
                elif kx == 2:
                    s = jnp.where(not_last_col, s, 0.0)
                part = jnp.dot(w_ref[ky * 3 + kx], s,
                               preferred_element_type=jnp.float32)
                acc = part if acc is None else acc + part        # init from first tap
        return acc

    x = x_ref[...].astype(jnp.float32)
    mid = jnp.maximum(conv3x3(x, w1_ref) + b1_ref[...], 0.0)     # conv1 + bias + ReLU
    y = conv3x3(mid, w2_ref) + b2_ref[...]                       # conv2 + bias
    o_ref[...] = (x + y).astype(o_ref.dtype)                     # residual add


def _per_tap_block_diag_weights(w_oihw, images_per_step):
    """(C_out, C_in, 3, 3) OIHW -> (9, Nb*C_out, Nb*C_in) block-diagonal tap matrices."""
    c_out, c_in, kh, kw = w_oihw.shape
    taps = jnp.transpose(w_oihw, (2, 3, 0, 1)).reshape(kh * kw, c_out, c_in)  # (9, o, i)
    eye = jnp.eye(images_per_step, dtype=w_oihw.dtype)
    blk = eye[None, :, None, :, None] * taps[:, None, :, None, :]  # (9, Nb, o, Nb, i)
    return blk.reshape(kh * kw, images_per_step * c_out, images_per_step * c_in)


def _pick_images_per_step(n_images, channels, max_images=8):
    # Largest divisor of N (<= max_images) whose row block Nb*C is sublane(8)-aligned;
    # fall back to the whole batch as one block (block == full array is always legal).
    for d in range(min(n_images, max_images), 0, -1):
        if n_images % d == 0 and (d * channels) % 8 == 0:
            return d
    return n_images


def residual_block_fp(x_nchw, w1, b1, w2, b2):
    """ResidualBlockFP forward: x + conv2(relu(conv1(x))).

    x_nchw: (N, C, H, W) f32; w1/w2: (C, C, 3, 3) OIHW (PyTorch layout); b1/b2: (C,).
    Returns (N, C, H, W).
    """
    n, c, h, w = x_nchw.shape
    hw = h * w
    nb = _pick_images_per_step(n, c)
    rows = nb * c
    halo = w + 1
    pad_w = hw + 2 * halo

    # Free row-major reshape: the only HBM copy of x the kernel reads (no transposes).
    x2 = x_nchw.reshape(n * c, hw)
    w1b = _per_tap_block_diag_weights(w1, nb)
    w2b = _per_tap_block_diag_weights(w2, nb)
    b1b = jnp.tile(b1, nb).reshape(rows, 1)
    b2b = jnp.tile(b2, nb).reshape(rows, 1)

    out2 = pl.pallas_call(
        functools.partial(_resblock_kernel, width=w),
        out_shape=jax.ShapeDtypeStruct((n * c, hw), x_nchw.dtype),
        grid_spec=pltpu.PrefetchScalarGridSpec(
            num_scalar_prefetch=0,
            grid=(n // nb,),
            in_specs=[
                pl.BlockSpec((rows, hw), lambda i: (i, 0)),
                pl.BlockSpec((9, rows, rows), lambda i: (0, 0, 0)),
                pl.BlockSpec((rows, 1), lambda i: (0, 0)),
                pl.BlockSpec((9, rows, rows), lambda i: (0, 0, 0)),
                pl.BlockSpec((rows, 1), lambda i: (0, 0)),
            ],
            out_specs=pl.BlockSpec((rows, hw), lambda i: (i, 0)),
            scratch_shapes=[pltpu.VMEM((rows, pad_w), jnp.float32)],
        ),
        compiler_params=pltpu.CompilerParams(
            dimension_semantics=("parallel",),
        ),
    )(x2, w1b, b1b, w2b, b2b)

    return out2.reshape(n, c, h, w)


def _reference(x, w1, b1, w2, b2):
    """Pure-JAX reference (NCHW conv, OIHW weights) of x + conv(relu(conv(x)))."""
    dn = jax.lax.conv_dimension_numbers(x.shape, w1.shape, ("NCHW", "OIHW", "NCHW"))

    def conv(v, wt):
        return jax.lax.conv_general_dilated(
            v, wt, (1, 1), "SAME", dimension_numbers=dn,
            precision=jax.lax.Precision.HIGHEST)

    y = jnp.maximum(conv(x, w1) + b1[None, :, None, None], 0.0)
    y = conv(y, w2) + b2[None, :, None, None]
    return x + y


if __name__ == "__main__":
    N, C, H, W = 2, 4, 16, 16
    key = jax.random.PRNGKey(0)
    kx_, kw1, kb1, kw2, kb2 = jax.random.split(key, 5)

    # PyTorch Conv2d default init: U(-1/sqrt(fan_in), 1/sqrt(fan_in)), fan_in = C*3*3.
    fan_in = C * 3 * 3
    bound = 1.0 / (fan_in ** 0.5)
    x = jax.random.normal(kx_, (N, C, H, W), jnp.float32)
    w1 = jax.random.uniform(kw1, (C, C, 3, 3), jnp.float32, -bound, bound)
    b1 = jax.random.uniform(kb1, (C,), jnp.float32, -bound, bound)
    w2 = jax.random.uniform(kw2, (C, C, 3, 3), jnp.float32, -bound, bound)
    b2 = jax.random.uniform(kb2, (C,), jnp.float32, -bound, bound)

    out = jax.block_until_ready(residual_block_fp(x, w1, b1, w2, b2))
    ref = jax.block_until_ready(_reference(x, w1, b1, w2, b2))

    assert out.shape == (N, C, H, W)
    # Tolerance covers MXU pass decomposition / summation-order drift vs. the XLA conv.
    assert jnp.allclose(out, ref, atol=2e-3, rtol=2e-3), float(jnp.max(jnp.abs(out - ref)))

    print("KERNEL_OK")
</pallas_src>

<mosaic_0001>
module attributes {stable_mosaic.version = 11 : i64} {
  func.func @_resblock_kernel(%arg0: i32, %arg1: memref<8x256xf32, #tpu.memory_space<vmem>>, %arg2: memref<9x8x8xf32, #tpu.memory_space<vmem>>, %arg3: memref<8x1xf32, #tpu.memory_space<vmem>>, %arg4: memref<9x8x8xf32, #tpu.memory_space<vmem>>, %arg5: memref<8x1xf32, #tpu.memory_space<vmem>>, %arg6: memref<8x256xf32, #tpu.memory_space<vmem>>, %arg7: memref<8x290xf32, #tpu.memory_space<vmem>>) attributes {dimension_semantics = [#tpu.dimension_semantics<parallel>], iteration_bounds = array<i64: 1>, scalar_prefetch = 0 : i64, scratch_operands = 1 : i64, tpu.core_type = #tpu.core_type<tc>, window_params = [{transform_indices = @transform_0, window_bounds = array<i64: 8, 256>}, {pipeline_mode = #tpu.pipeline_mode<synchronous>, transform_indices = @transform_1, window_bounds = array<i64: 9, 8, 8>}, {pipeline_mode = #tpu.pipeline_mode<synchronous>, transform_indices = @transform_2, window_bounds = array<i64: 8, 1>}, {pipeline_mode = #tpu.pipeline_mode<synchronous>, transform_indices = @transform_3, window_bounds = array<i64: 9, 8, 8>}, {pipeline_mode = #tpu.pipeline_mode<synchronous>, transform_indices = @transform_4, window_bounds = array<i64: 8, 1>}, {transform_indices = @transform_5, window_bounds = array<i64: 8, 256>}]} {
    %0 = tpu.iota {dimensions = array<i32: 1>} : vector<1x256xi32>
    %c16_i32 = arith.constant 16 : i32
    %c0_i32 = arith.constant 0 : i32
    %1 = arith.cmpi eq, %c16_i32, %c0_i32 : i32
    %c1_i32 = arith.constant 1 : i32
    %2 = arith.select %1, %c1_i32, %c16_i32 : i32
    %3 = vector.broadcast %2 : i32 to vector<1x256xi32>
    %4 = arith.remsi %0, %3 : vector<1x256xi32>
    %c0_i32_0 = arith.constant 0 : i32
    %5 = vector.broadcast %c0_i32_0 : i32 to vector<1x256xi32>
    %6 = arith.cmpi ne, %4, %5 : vector<1x256xi32>
    %c0_i32_1 = arith.constant 0 : i32
    %7 = vector.broadcast %c0_i32_1 : i32 to vector<1x256xi32>
    %8 = arith.cmpi slt, %4, %7 : vector<1x256xi32>
    %c0_i32_2 = arith.constant 0 : i32
    %9 = arith.cmpi slt, %2, %c0_i32_2 : i32
    %10 = vector.broadcast %9 : i1 to vector<1x256xi1>
    %11 = vector.broadcast %10 : vector<1x256xi1> to vector<1x256xi1>
    %12 = arith.xori %8, %11 : vector<1x256xi1>
    %13 = arith.andi %12, %6 : vector<1x256xi1>
    %14 = vector.broadcast %2 : i32 to vector<1x256xi32>
    %15 = arith.addi %4, %14 : vector<1x256xi32>
    %16 = arith.select %13, %15, %4 : vector<1x256xi1>, vector<1x256xi32>
    %c0_i32_3 = arith.constant 0 : i32
    %17 = vector.broadcast %c0_i32_3 : i32 to vector<1x256xi32>
    %18 = arith.cmpi ne, %16, %17 : vector<1x256xi32>
    %c15_i32 = arith.constant 15 : i32
    %19 = vector.broadcast %c15_i32 : i32 to vector<1x256xi32>
    %20 = arith.cmpi ne, %16, %19 : vector<1x256xi32>
    %cst = arith.constant 0.000000e+00 : f32
    %21 = vector.broadcast %cst : f32 to vector<8x17xf32>
    %c0 = arith.constant 0 : index
    %c0_4 = arith.constant 0 : index
    %22 = vector.load %arg7[%c0, %c0_4] : memref<8x290xf32, #tpu.memory_space<vmem>>, vector<8x17xf32>
    tpu.vector_store %arg7[%c0, %c0_4], %21 {strides = array<i32>} : memref<8x290xf32, #tpu.memory_space<vmem>>, vector<8x17xf32>,
    %cst_5 = arith.constant 0.000000e+00 : f32
    %23 = vector.broadcast %cst_5 : f32 to vector<8x17xf32>
    %c0_6 = arith.constant 0 : index
    %c273 = arith.constant 273 : index
    %24 = vector.load %arg7[%c0_6, %c273] : memref<8x290xf32, #tpu.memory_space<vmem>>, vector<8x17xf32>
    tpu.vector_store %arg7[%c0_6, %c273], %23 {strides = array<i32>} : memref<8x290xf32, #tpu.memory_space<vmem>>, vector<8x17xf32>,
    %c0_7 = arith.constant 0 : index
    %c0_8 = arith.constant 0 : index
    %25 = vector.load %arg1[%c0_7, %c0_8] : memref<8x256xf32, #tpu.memory_space<vmem>>, vector<8x256xf32>
    %c0_9 = arith.constant 0 : index
    %c17 = arith.constant 17 : index
    %26 = vector.load %arg7[%c0_9, %c17] : memref<8x290xf32, #tpu.memory_space<vmem>>, vector<8x256xf32>
    tpu.vector_store %arg7[%c0_9, %c17], %25 {strides = array<i32>} : memref<8x290xf32, #tpu.memory_space<vmem>>, vector<8x256xf32>,
    %c0_10 = arith.constant 0 : index
    %c0_11 = arith.constant 0 : index
    %27 = vector.load %arg7[%c0_10, %c0_11] : memref<8x290xf32, #tpu.memory_space<vmem>>, vector<8x256xf32>
    %cst_12 = arith.constant 0.000000e+00 : f32
    %28 = vector.shape_cast %18 : vector<1x256xi1> to vector<1x256xi1>
    %29 = vector.broadcast %28 : vector<1x256xi1> to vector<8x256xi1>
    %30 = vector.broadcast %cst_12 : f32 to vector<8x256xf32>
    %31 = arith.select %29, %27, %30 : vector<8x256xi1>, vector<8x256xf32>
    %c0_13 = arith.constant 0 : index
    %c0_14 = arith.constant 0 : index
    %c0_15 = arith.constant 0 : index
    %32 = vector.load %arg2[%c0_13, %c0_14, %c0_15] : memref<9x8x8xf32, #tpu.memory_space<vmem>>, vector<1x8x8xf32>
    %33 = vector.shape_cast %32 : vector<1x8x8xf32> to vector<8x8xf32>
    %cst_16 = arith.constant dense<0.000000e+00> : vector<8x256xf32>
    %34 = tpu.matmul %33, %31, %cst_16 {dimension_numbers = #tpu.dot_dimension_numbers<[1], [0], [0], [1], [0, 0, 1, 1], [], []>} : vector<8x8xf32>, vector<8x256xf32>, vector<8x256xf32> -> vector<8x256xf32>
    %c0_17 = arith.constant 0 : index
    %c1 = arith.constant 1 : index
    %35 = vector.load %arg7[%c0_17, %c1] : memref<8x290xf32, #tpu.memory_space<vmem>>, vector<8x256xf32>
    %c1_18 = arith.constant 1 : index
    %c0_19 = arith.constant 0 : index
    %c0_20 = arith.constant 0 : index
    %36 = vector.load %arg2[%c1_18, %c0_19, %c0_20] : memref<9x8x8xf32, #tpu.memory_space<vmem>>, vector<1x8x8xf32>
    %37 = vector.shape_cast %36 : vector<1x8x8xf32> to vector<8x8xf32>
    %cst_21 = arith.constant dense<0.000000e+00> : vector<8x256xf32>
    %38 = tpu.matmul %37, %35, %cst_21 {dimension_numbers = #tpu.dot_dimension_numbers<[1], [0], [0], [1], [0, 0, 1, 1], [], []>} : vector<8x8xf32>, vector<8x256xf32>, vector<8x256xf32> -> vector<8x256xf32>
    %39 = arith.addf %34, %38 : vector<8x256xf32>
    %c0_22 = arith.constant 0 : index
    %c2 = arith.constant 2 : index
    %40 = vector.load %arg7[%c0_22, %c2] : memref<8x290xf32, #tpu.memory_space<vmem>>, vector<8x256xf32>
    %cst_23 = arith.constant 0.000000e+00 : f32
    %41 = vector.shape_cast %20 : vector<1x256xi1> to vector<1x256xi1>
    %42 = vector.broadcast %41 : vector<1x256xi1> to vector<8x256xi1>
    %43 = vector.broadcast %cst_23 : f32 to vector<8x256xf32>
    %44 = arith.select %42, %40, %43 : vector<8x256xi1>, vector<8x256xf32>
    %c2_24 = arith.constant 2 : index
    %c0_25 = arith.constant 0 : index
    %c0_26 = arith.constant 0 : index
    %45 = vector.load %arg2[%c2_24, %c0_25, %c0_26] : memref<9x8x8xf32, #tpu.memory_space<vmem>>, vector<1x8x8xf32>
    %46 = vector.shape_cast %45 : vector<1x8x8xf32> to vector<8x8xf32>
    %cst_27 = arith.constant dense<0.000000e+00> : vector<8x256xf32>
    %47 = tpu.matmul %46, %44, %cst_27 {dimension_numbers = #tpu.dot_dimension_numbers<[1], [0], [0], [1], [0, 0, 1, 1], [], []>} : vector<8x8xf32>, vector<8x256xf32>, vector<8x256xf32> -> vector<8x256xf32>
    %48 = arith.addf %39, %47 : vector<8x256xf32>
    %c0_28 = arith.constant 0 : index
    %c16 = arith.constant 16 : index
    %49 = vector.load %arg7[%c0_28, %c16] : memref<8x290xf32, #tpu.memory_space<vmem>>, vector<8x256xf32>
    %cst_29 = arith.constant 0.000000e+00 : f32
    %50 = vector.shape_cast %18 : vector<1x256xi1> to vector<1x256xi1>
    %51 = vector.broadcast %50 : vector<1x256xi1> to vector<8x256xi1>
    %52 = vector.broadcast %cst_29 : f32 to vector<8x256xf32>
    %53 = arith.select %51, %49, %52 : vector<8x256xi1>, vector<8x256xf32>
    %c3 = arith.constant 3 : index
    %c0_30 = arith.constant 0 : index
    %c0_31 = arith.constant 0 : index
    %54 = vector.load %arg2[%c3, %c0_30, %c0_31] : memref<9x8x8xf32, #tpu.memory_space<vmem>>, vector<1x8x8xf32>
    %55 = vector.shape_cast %54 : vector<1x8x8xf32> to vector<8x8xf32>
    %cst_32 = arith.constant dense<0.000000e+00> : vector<8x256xf32>
    %56 = tpu.matmul %55, %53, %cst_32 {dimension_numbers = #tpu.dot_dimension_numbers<[1], [0], [0], [1], [0, 0, 1, 1], [], []>} : vector<8x8xf32>, vector<8x256xf32>, vector<8x256xf32> -> vector<8x256xf32>
    %57 = arith.addf %48, %56 : vector<8x256xf32>
    %c0_33 = arith.constant 0 : index
    %c17_34 = arith.constant 17 : index
    %58 = vector.load %arg7[%c0_33, %c17_34] : memref<8x290xf32, #tpu.memory_space<vmem>>, vector<8x256xf32>
    %c4 = arith.constant 4 : index
    %c0_35 = arith.constant 0 : index
    %c0_36 = arith.constant 0 : index
    %59 = vector.load %arg2[%c4, %c0_35, %c0_36] : memref<9x8x8xf32, #tpu.memory_space<vmem>>, vector<1x8x8xf32>
    %60 = vector.shape_cast %59 : vector<1x8x8xf32> to vector<8x8xf32>
    %cst_37 = arith.constant dense<0.000000e+00> : vector<8x256xf32>
    %61 = tpu.matmul %60, %58, %cst_37 {dimension_numbers = #tpu.dot_dimension_numbers<[1], [0], [0], [1], [0, 0, 1, 1], [], []>} : vector<8x8xf32>, vector<8x256xf32>, vector<8x256xf32> -> vector<8x256xf32>
    %62 = arith.addf %57, %61 : vector<8x256xf32>
    %c0_38 = arith.constant 0 : index
    %c18 = arith.constant 18 : index
    %63 = vector.load %arg7[%c0_38, %c18] : memref<8x290xf32, #tpu.memory_space<vmem>>, vector<8x256xf32>
    %cst_39 = arith.constant 0.000000e+00 : f32
    %64 = vector.shape_cast %20 : vector<1x256xi1> to vector<1x256xi1>
    %65 = vector.broadcast %64 : vector<1x256xi1> to vector<8x256xi1>
    %66 = vector.broadcast %cst_39 : f32 to vector<8x256xf32>
    %67 = arith.select %65, %63, %66 : vector<8x256xi1>, vector<8x256xf32>
    %c5 = arith.constant 5 : index
    %c0_40 = arith.constant 0 : index
    %c0_41 = arith.constant 0 : index
    %68 = vector.load %arg2[%c5, %c0_40, %c0_41] : memref<9x8x8xf32, #tpu.memory_space<vmem>>, vector<1x8x8xf32>
    %69 = vector.shape_cast %68 : vector<1x8x8xf32> to vector<8x8xf32>
    %cst_42 = arith.constant dense<0.000000e+00> : vector<8x256xf32>
    %70 = tpu.matmul %69, %67, %cst_42 {dimension_numbers = #tpu.dot_dimension_numbers<[1], [0], [0], [1], [0, 0, 1, 1], [], []>} : vector<8x8xf32>, vector<8x256xf32>, vector<8x256xf32> -> vector<8x256xf32>
    %71 = arith.addf %62, %70 : vector<8x256xf32>
    %c0_43 = arith.constant 0 : index
    %c32 = arith.constant 32 : index
    %72 = vector.load %arg7[%c0_43, %c32] : memref<8x290xf32, #tpu.memory_space<vmem>>, vector<8x256xf32>
    %cst_44 = arith.constant 0.000000e+00 : f32
    %73 = vector.shape_cast %18 : vector<1x256xi1> to vector<1x256xi1>
    %74 = vector.broadcast %73 : vector<1x256xi1> to vector<8x256xi1>
    %75 = vector.broadcast %cst_44 : f32 to vector<8x256xf32>
    %76 = arith.select %74, %72, %75 : vector<8x256xi1>, vector<8x256xf32>
    %c6 = arith.constant 6 : index
    %c0_45 = arith.constant 0 : index
    %c0_46 = arith.constant 0 : index
    %77 = vector.load %arg2[%c6, %c0_45, %c0_46] : memref<9x8x8xf32, #tpu.memory_space<vmem>>, vector<1x8x8xf32>
    %78 = vector.shape_cast %77 : vector<1x8x8xf32> to vector<8x8xf32>
    %cst_47 = arith.constant dense<0.000000e+00> : vector<8x256xf32>
    %79 = tpu.matmul %78, %76, %cst_47 {dimension_numbers = #tpu.dot_dimension_numbers<[1], [0], [0], [1], [0, 0, 1, 1], [], []>} : vector<8x8xf32>, vector<8x256xf32>, vector<8x256xf32> -> vector<8x256xf32>
    %80 = arith.addf %71, %79 : vector<8x256xf32>
    %c0_48 = arith.constant 0 : index
    %c33 = arith.constant 33 : index
    %81 = vector.load %arg7[%c0_48, %c33] : memref<8x290xf32, #tpu.memory_space<vmem>>, vector<8x256xf32>
    %c7 = arith.constant 7 : index
    %c0_49 = arith.constant 0 : index
    %c0_50 = arith.constant 0 : index
    %82 = vector.load %arg2[%c7, %c0_49, %c0_50] : memref<9x8x8xf32, #tpu.memory_space<vmem>>, vector<1x8x8xf32>
    %83 = vector.shape_cast %82 : vector<1x8x8xf32> to vector<8x8xf32>
    %cst_51 = arith.constant dense<0.000000e+00> : vector<8x256xf32>
    %84 = tpu.matmul %83, %81, %cst_51 {dimension_numbers = #tpu.dot_dimension_numbers<[1], [0], [0], [1], [0, 0, 1, 1], [], []>} : vector<8x8xf32>, vector<8x256xf32>, vector<8x256xf32> -> vector<8x256xf32>
    %85 = arith.addf %80, %84 : vector<8x256xf32>
    %c0_52 = arith.constant 0 : index
    %c34 = arith.constant 34 : index
    %86 = vector.load %arg7[%c0_52, %c34] : memref<8x290xf32, #tpu.memory_space<vmem>>, vector<8x256xf32>
    %cst_53 = arith.constant 0.000000e+00 : f32
    %87 = vector.shape_cast %20 : vector<1x256xi1> to vector<1x256xi1>
    %88 = vector.broadcast %87 : vector<1x256xi1> to vector<8x256xi1>
    %89 = vector.broadcast %cst_53 : f32 to vector<8x256xf32>
    %90 = arith.select %88, %86, %89 : vector<8x256xi1>, vector<8x256xf32>
    %c8 = arith.constant 8 : index
    %c0_54 = arith.constant 0 : index
    %c0_55 = arith.constant 0 : index
    %91 = vector.load %arg2[%c8, %c0_54, %c0_55] : memref<9x8x8xf32, #tpu.memory_space<vmem>>, vector<1x8x8xf32>
    %92 = vector.shape_cast %91 : vector<1x8x8xf32> to vector<8x8xf32>
    %cst_56 = arith.constant dense<0.000000e+00> : vector<8x256xf32>
    %93 = tpu.matmul %92, %90, %cst_56 {dimension_numbers = #tpu.dot_dimension_numbers<[1], [0], [0], [1], [0, 0, 1, 1], [], []>} : vector<8x8xf32>, vector<8x256xf32>, vector<8x256xf32> -> vector<8x256xf32>
    %94 = arith.addf %85, %93 : vector<8x256xf32>
    %c0_57 = arith.constant 0 : index
    %c0_58 = arith.constant 0 : index
    %95 = vector.load %arg3[%c0_57, %c0_58] : memref<8x1xf32, #tpu.memory_space<vmem>>, vector<8x1xf32>
    %96 = vector.broadcast %95 : vector<8x1xf32> to vector<8x256xf32>
    %97 = arith.addf %94, %96 : vector<8x256xf32>
    %cst_59 = arith.constant 0.000000e+00 : f32
    %98 = vector.broadcast %cst_59 : f32 to vector<8x256xf32>
    %99 = arith.maximumf %97, %98 : vector<8x256xf32>
    %c0_60 = arith.constant 0 : index
    %c17_61 = arith.constant 17 : index
    %100 = vector.load %arg7[%c0_60, %c17_61] : memref<8x290xf32, #tpu.memory_space<vmem>>, vector<8x256xf32>
    tpu.vector_store %arg7[%c0_60, %c17_61], %99 {strides = array<i32>} : memref<8x290xf32, #tpu.memory_space<vmem>>, vector<8x256xf32>,
    %c0_62 = arith.constant 0 : index
    %c0_63 = arith.constant 0 : index
    %101 = vector.load %arg7[%c0_62, %c0_63] : memref<8x290xf32, #tpu.memory_space<vmem>>, vector<8x256xf32>
    %cst_64 = arith.constant 0.000000e+00 : f32
    %102 = vector.shape_cast %18 : vector<1x256xi1> to vector<1x256xi1>
    %103 = vector.broadcast %102 : vector<1x256xi1> to vector<8x256xi1>
    %104 = vector.broadcast %cst_64 : f32 to vector<8x256xf32>
    %105 = arith.select %103, %101, %104 : vector<8x256xi1>, vector<8x256xf32>
    %c0_65 = arith.constant 0 : index
    %c0_66 = arith.constant 0 : index
    %c0_67 = arith.constant 0 : index
    %106 = vector.load %arg4[%c0_65, %c0_66, %c0_67] : memref<9x8x8xf32, #tpu.memory_space<vmem>>, vector<1x8x8xf32>
    %107 = vector.shape_cast %106 : vector<1x8x8xf32> to vector<8x8xf32>
    %cst_68 = arith.constant dense<0.000000e+00> : vector<8x256xf32>
    %108 = tpu.matmul %107, %105, %cst_68 {dimension_numbers = #tpu.dot_dimension_numbers<[1], [0], [0], [1], [0, 0, 1, 1], [], []>} : vector<8x8xf32>, vector<8x256xf32>, vector<8x256xf32> -> vector<8x256xf32>
    %c0_69 = arith.constant 0 : index
    %c1_70 = arith.constant 1 : index
    %109 = vector.load %arg7[%c0_69, %c1_70] : memref<8x290xf32, #tpu.memory_space<vmem>>, vector<8x256xf32>
    %c1_71 = arith.constant 1 : index
    %c0_72 = arith.constant 0 : index
    %c0_73 = arith.constant 0 : index
    %110 = vector.load %arg4[%c1_71, %c0_72, %c0_73] : memref<9x8x8xf32, #tpu.memory_space<vmem>>, vector<1x8x8xf32>
    %111 = vector.shape_cast %110 : vector<1x8x8xf32> to vector<8x8xf32>
    %cst_74 = arith.constant dense<0.000000e+00> : vector<8x256xf32>
    %112 = tpu.matmul %111, %109, %cst_74 {dimension_numbers = #tpu.dot_dimension_numbers<[1], [0], [0], [1], [0, 0, 1, 1], [], []>} : vector<8x8xf32>, vector<8x256xf32>, vector<8x256xf32> -> vector<8x256xf32>
    %113 = arith.addf %108, %112 : vector<8x256xf32>
    %c0_75 = arith.constant 0 : index
    %c2_76 = arith.constant 2 : index
    %114 = vector.load %arg7[%c0_75, %c2_76] : memref<8x290xf32, #tpu.memory_space<vmem>>, vector<8x256xf32>
    %cst_77 = arith.constant 0.000000e+00 : f32
    %115 = vector.shape_cast %20 : vector<1x256xi1> to vector<1x256xi1>
    %116 = vector.broadcast %115 : vector<1x256xi1> to vector<8x256xi1>
    %117 = vector.broadcast %cst_77 : f32 to vector<8x256xf32>
    %118 = arith.select %116, %114, %117 : vector<8x256xi1>, vector<8x256xf32>
    %c2_78 = arith.constant 2 : index
    %c0_79 = arith.constant 0 : index
    %c0_80 = arith.constant 0 : index
    %119 = vector.load %arg4[%c2_78, %c0_79, %c0_80] : memref<9x8x8xf32, #tpu.memory_space<vmem>>, vector<1x8x8xf32>
    %120 = vector.shape_cast %119 : vector<1x8x8xf32> to vector<8x8xf32>
    %cst_81 = arith.constant dense<0.000000e+00> : vector<8x256xf32>
    %121 = tpu.matmul %120, %118, %cst_81 {dimension_numbers = #tpu.dot_dimension_numbers<[1], [0], [0], [1], [0, 0, 1, 1], [], []>} : vector<8x8xf32>, vector<8x256xf32>, vector<8x256xf32> -> vector<8x256xf32>
    %122 = arith.addf %113, %121 : vector<8x256xf32>
    %c0_82 = arith.constant 0 : index
    %c16_83 = arith.constant 16 : index
    %123 = vector.load %arg7[%c0_82, %c16_83] : memref<8x290xf32, #tpu.memory_space<vmem>>, vector<8x256xf32>
    %cst_84 = arith.constant 0.000000e+00 : f32
    %124 = vector.shape_cast %18 : vector<1x256xi1> to vector<1x256xi1>
    %125 = vector.broadcast %124 : vector<1x256xi1> to vector<8x256xi1>
    %126 = vector.broadcast %cst_84 : f32 to vector<8x256xf32>
    %127 = arith.select %125, %123, %126 : vector<8x256xi1>, vector<8x256xf32>
    %c3_85 = arith.constant 3 : index
    %c0_86 = arith.constant 0 : index
    %c0_87 = arith.constant 0 : index
    %128 = vector.load %arg4[%c3_85, %c0_86, %c0_87] : memref<9x8x8xf32, #tpu.memory_space<vmem>>, vector<1x8x8xf32>
    %129 = vector.shape_cast %128 : vector<1x8x8xf32> to vector<8x8xf32>
    %cst_88 = arith.constant dense<0.000000e+00> : vector<8x256xf32>
    %130 = tpu.matmul %129, %127, %cst_88 {dimension_numbers = #tpu.dot_dimension_numbers<[1], [0], [0], [1], [0, 0, 1, 1], [], []>} : vector<8x8xf32>, vector<8x256xf32>, vector<8x256xf32> -> vector<8x256xf32>
    %131 = arith.addf %122, %130 : vector<8x256xf32>
    %c0_89 = arith.constant 0 : index
    %c17_90 = arith.constant 17 : index
    %132 = vector.load %arg7[%c0_89, %c17_90] : memref<8x290xf32, #tpu.memory_space<vmem>>, vector<8x256xf32>
    %c4_91 = arith.constant 4 : index
    %c0_92 = arith.constant 0 : index
    %c0_93 = arith.constant 0 : index
    %133 = vector.load %arg4[%c4_91, %c0_92, %c0_93] : memref<9x8x8xf32, #tpu.memory_space<vmem>>, vector<1x8x8xf32>
    %134 = vector.shape_cast %133 : vector<1x8x8xf32> to vector<8x8xf32>
    %cst_94 = arith.constant dense<0.000000e+00> : vector<8x256xf32>
    %135 = tpu.matmul %134, %132, %cst_94 {dimension_numbers = #tpu.dot_dimension_numbers<[1], [0], [0], [1], [0, 0, 1, 1], [], []>} : vector<8x8xf32>, vector<8x256xf32>, vector<8x256xf32> -> vector<8x256xf32>
    %136 = arith.addf %131, %135 : vector<8x256xf32>
    %c0_95 = arith.constant 0 : index
    %c18_96 = arith.constant 18 : index
    %137 = vector.load %arg7[%c0_95, %c18_96] : memref<8x290xf32, #tpu.memory_space<vmem>>, vector<8x256xf32>
    %cst_97 = arith.constant 0.000000e+00 : f32
    %138 = vector.shape_cast %20 : vector<1x256xi1> to vector<1x256xi1>
    %139 = vector.broadcast %138 : vector<1x256xi1> to vector<8x256xi1>
    %140 = vector.broadcast %cst_97 : f32 to vector<8x256xf32>
    %141 = arith.select %139, %137, %140 : vector<8x256xi1>, vector<8x256xf32>
    %c5_98 = arith.constant 5 : index
    %c0_99 = arith.constant 0 : index
    %c0_100 = arith.constant 0 : index
    %142 = vector.load %arg4[%c5_98, %c0_99, %c0_100] : memref<9x8x8xf32, #tpu.memory_space<vmem>>, vector<1x8x8xf32>
    %143 = vector.shape_cast %142 : vector<1x8x8xf32> to vector<8x8xf32>
    %cst_101 = arith.constant dense<0.000000e+00> : vector<8x256xf32>
    %144 = tpu.matmul %143, %141, %cst_101 {dimension_numbers = #tpu.dot_dimension_numbers<[1], [0], [0], [1], [0, 0, 1, 1], [], []>} : vector<8x8xf32>, vector<8x256xf32>, vector<8x256xf32> -> vector<8x256xf32>
    %145 = arith.addf %136, %144 : vector<8x256xf32>
    %c0_102 = arith.constant 0 : index
    %c32_103 = arith.constant 32 : index
    %146 = vector.load %arg7[%c0_102, %c32_103] : memref<8x290xf32, #tpu.memory_space<vmem>>, vector<8x256xf32>
    %cst_104 = arith.constant 0.000000e+00 : f32
    %147 = vector.shape_cast %18 : vector<1x256xi1> to vector<1x256xi1>
    %148 = vector.broadcast %147 : vector<1x256xi1> to vector<8x256xi1>
    %149 = vector.broadcast %cst_104 : f32 to vector<8x256xf32>
    %150 = arith.select %148, %146, %149 : vector<8x256xi1>, vector<8x256xf32>
    %c6_105 = arith.constant 6 : index
    %c0_106 = arith.constant 0 : index
    %c0_107 = arith.constant 0 : index
    %151 = vector.load %arg4[%c6_105, %c0_106, %c0_107] : memref<9x8x8xf32, #tpu.memory_space<vmem>>, vector<1x8x8xf32>
    %152 = vector.shape_cast %151 : vector<1x8x8xf32> to vector<8x8xf32>
    %cst_108 = arith.constant dense<0.000000e+00> : vector<8x256xf32>
    %153 = tpu.matmul %152, %150, %cst_108 {dimension_numbers = #tpu.dot_dimension_numbers<[1], [0], [0], [1], [0, 0, 1, 1], [], []>} : vector<8x8xf32>, vector<8x256xf32>, vector<8x256xf32> -> vector<8x256xf32>
    %154 = arith.addf %145, %153 : vector<8x256xf32>
    %c0_109 = arith.constant 0 : index
    %c33_110 = arith.constant 33 : index
    %155 = vector.load %arg7[%c0_109, %c33_110] : memref<8x290xf32, #tpu.memory_space<vmem>>, vector<8x256xf32>
    %c7_111 = arith.constant 7 : index
    %c0_112 = arith.constant 0 : index
    %c0_113 = arith.constant 0 : index
    %156 = vector.load %arg4[%c7_111, %c0_112, %c0_113] : memref<9x8x8xf32, #tpu.memory_space<vmem>>, vector<1x8x8xf32>
    %157 = vector.shape_cast %156 : vector<1x8x8xf32> to vector<8x8xf32>
    %cst_114 = arith.constant dense<0.000000e+00> : vector<8x256xf32>
    %158 = tpu.matmul %157, %155, %cst_114 {dimension_numbers = #tpu.dot_dimension_numbers<[1], [0], [0], [1], [0, 0, 1, 1], [], []>} : vector<8x8xf32>, vector<8x256xf32>, vector<8x256xf32> -> vector<8x256xf32>
    %159 = arith.addf %154, %158 : vector<8x256xf32>
    %c0_115 = arith.constant 0 : index
    %c34_116 = arith.constant 34 : index
    %160 = vector.load %arg7[%c0_115, %c34_116] : memref<8x290xf32, #tpu.memory_space<vmem>>, vector<8x256xf32>
    %cst_117 = arith.constant 0.000000e+00 : f32
    %161 = vector.shape_cast %20 : vector<1x256xi1> to vector<1x256xi1>
    %162 = vector.broadcast %161 : vector<1x256xi1> to vector<8x256xi1>
    %163 = vector.broadcast %cst_117 : f32 to vector<8x256xf32>
    %164 = arith.select %162, %160, %163 : vector<8x256xi1>, vector<8x256xf32>
    %c8_118 = arith.constant 8 : index
    %c0_119 = arith.constant 0 : index
    %c0_120 = arith.constant 0 : index
    %165 = vector.load %arg4[%c8_118, %c0_119, %c0_120] : memref<9x8x8xf32, #tpu.memory_space<vmem>>, vector<1x8x8xf32>
    %166 = vector.shape_cast %165 : vector<1x8x8xf32> to vector<8x8xf32>
    %cst_121 = arith.constant dense<0.000000e+00> : vector<8x256xf32>
    %167 = tpu.matmul %166, %164, %cst_121 {dimension_numbers = #tpu.dot_dimension_numbers<[1], [0], [0], [1], [0, 0, 1, 1], [], []>} : vector<8x8xf32>, vector<8x256xf32>, vector<8x256xf32> -> vector<8x256xf32>
    %168 = arith.addf %159, %167 : vector<8x256xf32>
    %c0_122 = arith.constant 0 : index
    %c0_123 = arith.constant 0 : index
    %169 = vector.load %arg5[%c0_122, %c0_123] : memref<8x1xf32, #tpu.memory_space<vmem>>, vector<8x1xf32>
    %170 = vector.broadcast %169 : vector<8x1xf32> to vector<8x256xf32>
    %171 = arith.addf %168, %170 : vector<8x256xf32>
    %172 = arith.addf %25, %171 : vector<8x256xf32>
    %c0_124 = arith.constant 0 : index
    %c0_125 = arith.constant 0 : index
    %173 = vector.load %arg6[%c0_124, %c0_125] : memref<8x256xf32, #tpu.memory_space<vmem>>, vector<8x256xf32>
    tpu.vector_store %arg6[%c0_124, %c0_125], %172 {strides = array<i32>} : memref<8x256xf32, #tpu.memory_space<vmem>>, vector<8x256xf32>,
    return
  }
  func.func @transform_0(%arg0: i32) -> (i32, i32) {
    %c0_i32 = arith.constant 0 : i32
    %c0_i32_0 = arith.constant 0 : i32
    return %arg0, %c0_i32 : i32, i32
  }
  func.func @transform_1(%arg0: i32) -> (i32, i32, i32) {
    %c0_i32 = arith.constant 0 : i32
    %c0_i32_0 = arith.constant 0 : i32
    %c0_i32_1 = arith.constant 0 : i32
    %c0_i32_2 = arith.constant 0 : i32
    return %c0_i32, %c0_i32_0, %c0_i32_1 : i32, i32, i32
  }
  func.func @transform_2(%arg0: i32) -> (i32, i32) {
    %c0_i32 = arith.constant 0 : i32
    %c0_i32_0 = arith.constant 0 : i32
    %c0_i32_1 = arith.constant 0 : i32
    return %c0_i32, %c0_i32_0 : i32, i32
  }
  func.func @transform_3(%arg0: i32) -> (i32, i32, i32) {
    %c0_i32 = arith.constant 0 : i32
    %c0_i32_0 = arith.constant 0 : i32
    %c0_i32_1 = arith.constant 0 : i32
    %c0_i32_2 = arith.constant 0 : i32
    return %c0_i32, %c0_i32_0, %c0_i32_1 : i32, i32, i32
  }
  func.func @transform_4(%arg0: i32) -> (i32, i32) {
    %c0_i32 = arith.constant 0 : i32
    %c0_i32_0 = arith.constant 0 : i32
    %c0_i32_1 = arith.constant 0 : i32
    return %c0_i32, %c0_i32_0 : i32, i32
  }
  func.func @transform_5(%arg0: i32) -> (i32, i32) {
    %c0_i32 = arith.constant 0 : i32
    %c0_i32_0 = arith.constant 0 : i32
    return %arg0, %c0_i32 : i32, i32
  }
}

</mosaic_0001>

<bundles_post_ra>
// kernel: tpu_custom_call.1
= control target key start
LH: loop header
LB: loop body
LE: loop exit
PB: predicated region body
PF: predicated region fallthrough
CT: control target
= control target key end

     0   :  { %vm52_vm0 = vcmask 138240   ;;  %s1855_s20 = smov 17   ;;  %v1856_v1 = vmov 0.0   ;;  %vm54_vm1 = vcmask 277640   ;;  %s2187_s0 = inlined_call_operand.vmem [shape: f32[8,256], index: 0, kind: input, shape index: {}]   ;;  %s2188_s1 = inlined_call_operand.vmem [shape: f32[9,8,8], index: 1, kind: input, shape index: {}]   ;;  %s2189_s2 = inlined_call_operand.vmem [shape: f32[8,1], index: 2, kind: input, shape index: {}]   ;;  %s2190_s3 = inlined_call_operand.vmem [shape: f32[9,8,8], index: 3, kind: input, shape index: {}]   ;;  %s2191_s4 = inlined_call_operand.vmem [shape: f32[8,1], index: 4, kind: input, shape index: {}]   ;;  %s2192_s5 = inlined_call_operand.hbm [shape: f32[8,256], index: 5, kind: output, shape index: {}]  }
   0x1   :  { %v1900_v0 = vld [vmem:[%s2187_s0] sm:$0xff]  ;;  %53 = vst.msk [vmem:[#allocation2] sm:$0xff] %vm52_vm0, %v1856_v1  ;;  %166 = vmatprep.mubr.f32.mxu0 %v1856_v1 }
   0x2   :  { %60 = vrot.lane.b32.xlu0 %v1900_v0, %s1855_s20 }
   0x3   :  { %10 = vsyncpa [#allocation4], 0  ;;  %v1910_v2 = vld [vmem:[%s2187_s0 + $0x8] sm:$0xff]  ;;  %55 = vst.msk [vmem:[#allocation2 + $0x10] sm:$0xff] %vm54_vm1, %v1856_v1  ;;  %995 = vmatprep.mubr.f32.mxu1 %v1856_v1  ;;  %vm68_vm2 = vcmask 1047688   ;;  %s1857_s23 = smov 127   ;;  %v21_v10 = vlaneseq }
   0x4   :  { %s1858_s0 = smov 126   ;;  %s1859_s24 = smov 112   ;;  %v884_v8 = vld [vmem:[%s2189_s2] sm:$0xff]  ;;  %v1865_v9 = vmov 0   ;;  %vm93_vm3 = vcmask 1039360   ;;  %v1728_v20 = vld [vmem:[%s2188_s1 + $0x8] sm:$0xff] }
   0x5   :  { %s1860_s25 = smov 111   ;;  %s1861_s26 = smov 110   ;;  %1830 = vset.pattern.permute.xlu0 %v1865_v9  ;;  %v22_v11 = vand.u32 127, %v21_v10  ;;  %vm98_vm4 = vcmask 64512   ;;  %vm257_vm6 = vcmask 1031168   ;;  %v80_v29 = vld [vmem:[%s2188_s1] sm:$0xff] }
   0x6   :  { %62 = vrot.lane.b32.xlu0 %v1910_v2, %s1855_s20  ;;  %s1862_s27 = smov 96   ;;  %s1863_s28 = smov 95   ;;  %vm348_vm10 = vcmask 916480   ;;  %v1733_v37 = vld [vmem:[%s2188_s1 + $0x10] sm:$0xff]  ;;  %vm441_vm11 = vcmask 908288   ;;  %v1737_v43 = vld [vmem:[%s2188_s1 + $0x18] sm:$0xff] }
   0x7   :  { %s1864_s29 = smov 94   ;;  %v23_v12 = vadd.s32 128, %v22_v11  ;;  %v28_v16 = vand.u32 15, %v22_v11  ;;  %vm528_vm12 = vcmask 900096   ;;  %v1741_v48 = vld [vmem:[%s2188_s1 + $0x20] sm:$0xff]  ;;  %vm619_vm13 = vcmask 785408  }
   0x8   :  { %v1743_v54 = vld [vmem:[%s2188_s1 + $0x28] sm:$0xff]  ;;  %vm712_vm14 = vcmask 777216   ;;  %v1747_v59 = vld [vmem:[%s2188_s1 + $0x30] sm:$0xff]  ;;  %vm799_vm15 = vcmask 769024   ;;  %s1866_s15 = smov [#allocation3]  }
   0x9   :  { %v35_v15 = vand.u32 15, %v23_v12  ;;  %vm1965_vm7 = vcmp.ne.s32.totalorder %v28_v16, 0  ;;  %vm1986_vm9 = vcmp.ne.s32.totalorder %v28_v16, 15  ;;  %v1776_v21 = vld [vmem:[%s2190_s3 + $0x30] sm:$0xff]  ;;  %s1720_s16 = sshll.u32 %s1866_s15, 4  ;;  %s1721_s16 = int_to_ptr.vmem [resolvable:$true] %s1720_s16 }
   0xa   :  { %s1831_s17 = scalar_lea.vmem %s1721_s16, 256  ;;  %p1836_p1 = scmp.lt.s32.totalorder %s1721_s16, %s1721_s16 }
   0xb   :  { %vm1960_vm5 = vcmp.ne.s32.totalorder %v35_v15, 0  ;;  %vm1969_vm8 = vcmp.ne.s32.totalorder %v35_v15, 15  ;;  %p1832_p0 = scmp.ne.s32.totalorder %s1721_s16, %s1831_s17  ;;  %p1837_p2 = scmp.lt.s32.totalorder %s1831_s17, %s1831_s17 }
   0xd   :  { %p1838_p3 = por %p1837_p2, %p1836_p1 }
   0xf   :  { %p1839_p4 = pnand %p1838_p3, %p1832_p0 }
  0x74   :  { %v61_v3 = vpop.permute.xlu0 %60 }
  0x75   :  { %69 = vst.msk [vmem:[#allocation2] sm:$0xff] %vm68_vm2, %v61_v3 }
  0x78   :  { %v63_v4 = vpop.permute.xlu0 %62 }
  0x79   :  { %v1918_v5 = vsel %vm52_vm0, %v61_v3, %v63_v4  ;;  %71 = vst.msk [vmem:[#allocation2 + $0x10] sm:$0xff] %vm52_vm0, %v63_v4  ;;  %v1751_v4 = vld [vmem:[%s2188_s1 + $0x38] sm:$0xff] }
  0x7a   :  { %89 = vrot.lane.b32.xlu1 %v1918_v5, %s1857_s23 }
  0x7c   :  { %v72_v6 = vld [vmem:[#allocation2] sm:$0xff] }
  0x7d   :  { %87 = vrot.lane.b32.xlu0 %v72_v6, %s1857_s23 }
  0x80   :  { %v81_v7 = vld [vmem:[#allocation2 + $0x10] sm:$0xff] }
  0x81   :  { %255 = vrot.lane.b32.xlu0 %v81_v7, %s1858_s0  ;;  %91 = vrot.lane.b32.xlu1 %v81_v7, %s1857_s23 }
  0x85   :  { %344 = vrot.lane.b32.xlu0 %v1918_v5, %s1859_s24  ;;  %253 = vrot.lane.b32.xlu1 %v1918_v5, %s1858_s0 }
  0x89   :  { %342 = vrot.lane.b32.xlu0 %v72_v6, %s1859_s24  ;;  %251 = vrot.lane.b32.xlu1 %v72_v6, %s1858_s0 }
  0x8d   :  { %439 = vrot.lane.b32.xlu0 %v81_v7, %s1860_s25  ;;  %346 = vrot.lane.b32.xlu1 %v81_v7, %s1859_s24 }
  0x91   :  { %524 = vrot.lane.b32.xlu0 %v1918_v5, %s1861_s26  ;;  %437 = vrot.lane.b32.xlu1 %v1918_v5, %s1860_s25 }
  0x95   :  { %522 = vrot.lane.b32.xlu0 %v72_v6, %s1861_s26  ;;  %435 = vrot.lane.b32.xlu1 %v72_v6, %s1860_s25 }
  0x99   :  { %617 = vrot.lane.b32.xlu0 %v81_v7, %s1862_s27  ;;  %526 = vrot.lane.b32.xlu1 %v81_v7, %s1861_s26 }
  0x9d   :  { %708 = vrot.lane.b32.xlu0 %v1918_v5, %s1863_s28  ;;  %615 = vrot.lane.b32.xlu1 %v1918_v5, %s1862_s27 }
  0xa1   :  { %706 = vrot.lane.b32.xlu0 %v72_v6, %s1863_s28  ;;  %613 = vrot.lane.b32.xlu1 %v72_v6, %s1862_s27 }
  0xa5   :  { %797 = vrot.lane.b32.xlu0 %v81_v7, %s1864_s29  ;;  %710 = vrot.lane.b32.xlu1 %v81_v7, %s1863_s28 }
  0xa9   :  { %795 = vrot.lane.b32.xlu1 %v1918_v5, %s1864_s29  ;;  %887 = vperm.xlu0 %1830, %v884_v8  }
  0xad   :  { %793 = vrot.lane.b32.xlu1 %v72_v6, %s1864_s29 }
  0xec   :  { %v90_v14 = vpop.permute.xlu1 %89 }
  0xef   :  { %v88_v13 = vpop.permute.xlu0 %87 }
  0xf0   :  { %v94_v22 = vsel %vm93_vm3, %v88_v13, %v90_v14 }
  0xf3   :  { %v256_v17 = vpop.permute.xlu0 %255  ;;  %v92_v18 = vpop.permute.xlu1 %91 }
  0xf4   :  { %v95_v19 = vsel %vm93_vm3, %v90_v14, %v92_v18 }
  0xf5   :  { %102 = vmatprep.subr.mxu0 %v95_v19  ;;  %v1702_v19 = vld [vmem:[%s2191_s4] sm:$0xff] }
  0xf6   :  { %103 = vmatpush1.msra.mxu0 %v94_v22 }
  0xf7   :  { %v345_v25 = vpop.permute.xlu0 %344  ;;  %v254_v26 = vpop.permute.xlu1 %253  ;;  %1729 = vmatmul.mubr.msk.f32.vlgmr.msra.gmra.mrb[0].mxu0 %vm98_vm4, %v1728_v20  ;;  %1730 = vmatprep.subr.msk.mxu0 %vm1960_vm5, %v1918_v5 }
  0xf8   :  { %v259_v27 = vsel %vm257_vm6, %v254_v26, %v256_v17  ;;  %1731 = vmatpush1.msk.msra.mxu0 %vm1965_vm7, %v72_v6  ;;  %240 = vmatprep.mubr.f32.mxu0 %v1856_v1  ;;  %v1753_v6 = vld [vmem:[%s2188_s1 + $0x40] sm:$0xff] }
  0xf9   :  { %1734 = vmatprep.subr.msk.mxu0 %vm1969_vm8, %v259_v27  ;;  %v1757_v27 = vld [vmem:[%s2190_s3 + $0x8] sm:$0xff] }
  0xfb   :  { %v252_v28 = vpop.permute.xlu1 %251  ;;  %v343_v30 = vpop.permute.xlu0 %342 }
  0xfc   :  { %v258_v32 = vsel %vm257_vm6, %v252_v28, %v254_v26  ;;  %v349_v38 = vsel %vm348_vm10, %v343_v30, %v345_v25 }
  0xff   :  { %v347_v33 = vpop.permute.xlu1 %346  ;;  %1732 = vmatmul.mubr.msk.f32.vlgmr.msra.gmra.mrb[0].mxu0 %vm98_vm4, %v80_v29  ;;  %v440_v35 = vpop.permute.xlu0 %439 }
 0x100   :  { %v350_v34 = vsel %vm348_vm10, %v345_v25, %v347_v33  ;;  %1735 = vmatpush1.msk.msra.mxu0 %vm1986_vm9, %v258_v32  ;;  %333 = vmatprep.mubr.f32.mxu0 %v1856_v1 }
 0x101   :  { %1738 = vmatprep.subr.msk.mxu0 %vm1960_vm5, %v350_v34 }
 0x103   :  { %v438_v36 = vpop.permute.xlu1 %437  ;;  %v525_v41 = vpop.permute.xlu0 %524 }
 0x104   :  { %v443_v40 = vsel %vm441_vm11, %v438_v36, %v440_v35  ;;  %v911_v35 = vld [vmem:[%s2190_s3] sm:$0xff] }
 0x107   :  { %v436_v39 = vpop.permute.xlu1 %435  ;;  %1736 = vmatmul.mubr.msk.f32.vlgmr.msra.gmra.mrb[0].mxu0 %vm98_vm4, %v1733_v37  ;;  %v523_v44 = vpop.permute.xlu0 %522 }
 0x108   :  { %1739 = vmatpush1.msk.msra.mxu0 %vm1965_vm7, %v349_v38  ;;  %424 = vmatprep.mubr.f32.mxu0 %v1856_v1  ;;  %v442_v45 = vsel %vm441_vm11, %v436_v39, %v438_v36  ;;  %v529_v50 = vsel %vm528_vm12, %v523_v44, %v525_v41 }
 0x109   :  { %449 = vmatprep.subr.mxu0 %v443_v40 }
 0x10b   :  { %v527_v42 = vpop.permute.xlu1 %526  ;;  %v618_v49 = vpop.permute.xlu0 %617 }
 0x10c   :  { %v530_v46 = vsel %vm528_vm12, %v525_v41, %v527_v42  ;;  %v1762_v42 = vld [vmem:[%s2190_s3 + $0x10] sm:$0xff] }
 0x10f   :  { %1740 = vmatmul.mubr.msk.f32.vlgmr.msra.gmra.mrb[0].mxu0 %vm98_vm4, %v1737_v43  ;;  %v616_v47 = vpop.permute.xlu1 %615  ;;  %v709_v53 = vpop.permute.xlu0 %708 }
 0x110   :  { %450 = vmatpush1.msra.mxu0 %v442_v45  ;;  %513 = vmatprep.mubr.f32.mxu0 %v1856_v1  ;;  %v621_v52 = vsel %vm619_vm13, %v616_v47, %v618_v49 }
 0x111   :  { %1744 = vmatprep.subr.msk.mxu0 %vm1969_vm8, %v530_v46 }
 0x113   :  { %v614_v51 = vpop.permute.xlu1 %613  ;;  %v707_v58 = vpop.permute.xlu0 %706 }
 0x114   :  { %v620_v56 = vsel %vm619_vm13, %v614_v51, %v616_v47  ;;  %v713_v61 = vsel %vm712_vm14, %v707_v58, %v709_v53 }
 0x117   :  { %1742 = vmatmul.mubr.msk.f32.vlgmr.msra.gmra.mrb[0].mxu0 %vm98_vm4, %v1741_v48  ;;  %v711_v55 = vpop.permute.xlu1 %710  ;;  %v798_v62 = vpop.permute.xlu0 %797  ;;  %v1766_v48 = vld [vmem:[%s2190_s3 + $0x18] sm:$0xff] }
 0x118   :  { %1745 = vmatpush1.msk.msra.mxu0 %vm1986_vm9, %v529_v50  ;;  %604 = vmatprep.mubr.f32.mxu0 %v1856_v1  ;;  %v714_v57 = vsel %vm712_vm14, %v709_v53, %v711_v55  ;;  %v1770_v53 = vld [vmem:[%s2190_s3 + $0x20] sm:$0xff] }
 0x119   :  { %1748 = vmatprep.subr.msk.mxu0 %vm1960_vm5, %v621_v52 }
 0x11b   :  { %v796_v60 = vpop.permute.xlu1 %795 }
 0x11c   :  { %v801_v63 = vsel %vm799_vm15, %v796_v60, %v798_v62 }
 0x11f   :  { %1746 = vmatmul.mubr.msk.f32.vlgmr.msra.gmra.mrb[0].mxu0 %vm98_vm4, %v1743_v54  ;;  %v794_v3 = vpop.permute.xlu1 %793 }
 0x120   :  { %1749 = vmatpush1.msk.msra.mxu0 %vm1965_vm7, %v620_v56  ;;  %695 = vmatprep.mubr.f32.mxu0 %v1856_v1  ;;  %v800_v5 = vsel %vm799_vm15, %v794_v3, %v796_v60 }
 0x121   :  { %720 = vmatprep.subr.mxu0 %v714_v57 }
 0x127   :  { %1750 = vmatmul.mubr.msk.f32.vlgmr.msra.gmra.mrb[0].mxu0 %vm98_vm4, %v1747_v59  ;;  %v1772_v59 = vld [vmem:[%s2190_s3 + $0x28] sm:$0xff] }
 0x128   :  { %721 = vmatpush1.msra.mxu0 %v713_v61  ;;  %784 = vmatprep.mubr.f32.mxu0 %v1856_v1  ;;  %v888_v7 = vpop.permute.xlu0 %887 }
 0x129   :  { %1754 = vmatprep.subr.msk.mxu0 %vm1969_vm8, %v801_v63 }
 0x12f   :  { %1752 = vmatmul.mubr.msk.f32.vlgmr.msra.gmra.mrb[0].mxu0 %vm98_vm4, %v1751_v4 }
 0x130   :  { %1755 = vmatpush1.msk.msra.mxu0 %vm1986_vm9, %v800_v5  ;;  %875 = vmatprep.mubr.f32.mxu0 %v1856_v1 }
 0x137   :  { %1756 = vmatmul.mubr.msk.f32.vlgmr.msra.gmra.mrb[0].mxu0 %vm98_vm4, %v1753_v6 }
 0x20a   :  { %v877_v8 = vpop.f32.mrb[0].mxu0 }
 0x20b   :  { %v890_v9 = vadd.f32 %v888_v7, %v877_v8  ;;  %v879_v10 = vpop.f32.mrb[1].mxu0 }
 0x20c   :  { %v891_v12 = vadd.f32 %v888_v7, %v879_v10  ;;  %v1780_v7 = vld [vmem:[%s2190_s3 + $0x38] sm:$0xff] }
 0x20d   :  { %v892_v11 = vmax.f32 %v890_v9, 0.0  ;;  %v1782_v9 = vld [vmem:[%s2190_s3 + $0x40] sm:$0xff] }
 0x20e   :  { %v893_v13 = vmax.f32 %v891_v12, 0.0 }
 0x20f   :  { %896 = vrot.lane.b32.xlu1 %v892_v11, %s1855_s20 }
 0x213   :  { %898 = vrot.lane.b32.xlu1 %v893_v13, %s1855_s20 }
 0x281   :  { %v897_v14 = vpop.permute.xlu1 %896 }
 0x282   :  { %904 = vst.msk [vmem:[#allocation2] sm:$0xff] %vm68_vm2, %v897_v14 }
 0x285   :  { %v899_v15 = vpop.permute.xlu1 %898 }
 0x286   :  { %v900_v16 = vsel %vm52_vm0, %v897_v14, %v899_v15  ;;  %906 = vst.msk [vmem:[#allocation2 + $0x10] sm:$0xff] %vm52_vm0, %v899_v15 }
 0x287   :  { %920 = vrot.lane.b32.xlu0 %v900_v16, %s1857_s23 }
 0x289   :  { %v907_v17 = vld [vmem:[#allocation2] sm:$0xff] }
 0x28b   :  { %918 = vrot.lane.b32.xlu0 %v907_v17, %s1857_s23 }
 0x28d   :  { %v912_v18 = vld [vmem:[#allocation2 + $0x10] sm:$0xff] }
 0x28e   :  { %922 = vrot.lane.b32.xlu1 %v912_v18, %s1857_s23 }
 0x28f   :  { %1080 = vrot.lane.b32.xlu0 %v912_v18, %s1858_s0 }
 0x292   :  { %1078 = vrot.lane.b32.xlu1 %v900_v16, %s1858_s0 }
 0x293   :  { %1168 = vrot.lane.b32.xlu0 %v900_v16, %s1859_s24 }
 0x296   :  { %1076 = vrot.lane.b32.xlu1 %v907_v17, %s1858_s0 }
 0x297   :  { %1166 = vrot.lane.b32.xlu0 %v907_v17, %s1859_s24 }
 0x29a   :  { %1170 = vrot.lane.b32.xlu1 %v912_v18, %s1859_s24 }
 0x29b   :  { %1262 = vrot.lane.b32.xlu0 %v912_v18, %s1860_s25 }
 0x29e   :  { %1260 = vrot.lane.b32.xlu1 %v900_v16, %s1860_s25 }
 0x29f   :  { %1346 = vrot.lane.b32.xlu0 %v900_v16, %s1861_s26 }
 0x2a2   :  { %1258 = vrot.lane.b32.xlu1 %v907_v17, %s1860_s25 }
 0x2a3   :  { %1344 = vrot.lane.b32.xlu0 %v907_v17, %s1861_s26 }
 0x2a6   :  { %1348 = vrot.lane.b32.xlu1 %v912_v18, %s1861_s26 }
 0x2a7   :  { %1438 = vrot.lane.b32.xlu0 %v912_v18, %s1862_s27 }
 0x2aa   :  { %1436 = vrot.lane.b32.xlu1 %v900_v16, %s1862_s27 }
 0x2ab   :  { %1528 = vrot.lane.b32.xlu0 %v900_v16, %s1863_s28 }
 0x2ae   :  { %1434 = vrot.lane.b32.xlu1 %v907_v17, %s1862_s27 }
 0x2af   :  { %1526 = vrot.lane.b32.xlu0 %v907_v17, %s1863_s28 }
 0x2b2   :  { %1530 = vrot.lane.b32.xlu1 %v912_v18, %s1863_s28 }
 0x2b3   :  { %1616 = vrot.lane.b32.xlu0 %v912_v18, %s1864_s29 }
 0x2b6   :  { %1614 = vrot.lane.b32.xlu1 %v900_v16, %s1864_s29 }
 0x2b7   :  { %1705 = vperm.xlu0 %1830, %v1702_v19  }
 0x2ba   :  { %1612 = vrot.lane.b32.xlu1 %v907_v17, %s1864_s29 }
 0x2f9   :  { %v921_v20 = vpop.permute.xlu0 %920 }
 0x2fd   :  { %v919_v22 = vpop.permute.xlu0 %918 }
 0x2fe   :  { %v924_v29 = vsel %vm93_vm3, %v919_v22, %v921_v20 }
 0x300   :  { %v923_v25 = vpop.permute.xlu1 %922 }
 0x301   :  { %v925_v26 = vsel %vm93_vm3, %v921_v20, %v923_v25  ;;  %v1081_v28 = vpop.permute.xlu0 %1080 }
 0x302   :  { %931 = vmatprep.subr.mxu1 %v925_v26 }
 0x303   :  { %932 = vmatpush1.msra.mxu1 %v924_v29 }
 0x304   :  { %v1079_v30 = vpop.permute.xlu1 %1078  ;;  %1758 = vmatmul.mubr.msk.f32.vlgmr.msra.gmra.mrb[0].mxu1 %vm98_vm4, %v1757_v27  ;;  %1759 = vmatprep.subr.msk.mxu1 %vm1960_vm5, %v900_v16 }
 0x305   :  { %1760 = vmatpush1.msk.msra.mxu1 %vm1965_vm7, %v907_v17  ;;  %v1083_v32 = vsel %vm257_vm6, %v1079_v30, %v1081_v28  ;;  %v1169_v33 = vpop.permute.xlu0 %1168  ;;  %1069 = vmatprep.mubr.f32.mxu1 %v1856_v1 }
 0x306   :  { %1763 = vmatprep.subr.msk.mxu1 %vm1969_vm8, %v1083_v32 }
 0x308   :  { %v1077_v34 = vpop.permute.xlu1 %1076 }
 0x309   :  { %v1167_v36 = vpop.permute.xlu0 %1166  ;;  %v1082_v37 = vsel %vm257_vm6, %v1077_v34, %v1079_v30 }
 0x30a   :  { %v1172_v43 = vsel %vm348_vm10, %v1167_v36, %v1169_v33 }
 0x30c   :  { %v1171_v38 = vpop.permute.xlu1 %1170  ;;  %1761 = vmatmul.mubr.msk.f32.vlgmr.msra.gmra.mrb[0].mxu1 %vm98_vm4, %v911_v35 }
 0x30d   :  { %v1173_v39 = vsel %vm348_vm10, %v1169_v33, %v1171_v38  ;;  %1764 = vmatpush1.msk.msra.mxu1 %vm1986_vm9, %v1082_v37  ;;  %1157 = vmatprep.mubr.f32.mxu1 %v1856_v1  ;;  %v1263_v41 = vpop.permute.xlu0 %1262 }
 0x30e   :  { %1767 = vmatprep.subr.msk.mxu1 %vm1960_vm5, %v1173_v39 }
 0x310   :  { %v1261_v40 = vpop.permute.xlu1 %1260 }
 0x311   :  { %v1265_v45 = vsel %vm441_vm11, %v1261_v40, %v1263_v41  ;;  %v1347_v46 = vpop.permute.xlu0 %1346 }
 0x314   :  { %v1259_v44 = vpop.permute.xlu1 %1258  ;;  %1765 = vmatmul.mubr.msk.f32.vlgmr.msra.gmra.mrb[0].mxu1 %vm98_vm4, %v1762_v42 }
 0x315   :  { %1768 = vmatpush1.msk.msra.mxu1 %vm1965_vm7, %v1172_v43  ;;  %1247 = vmatprep.mubr.f32.mxu1 %v1856_v1  ;;  %v1264_v49 = vsel %vm441_vm11, %v1259_v44, %v1261_v40  ;;  %v1345_v50 = vpop.permute.xlu0 %1344 }
 0x316   :  { %1271 = vmatprep.subr.mxu1 %v1265_v45  ;;  %v1350_v55 = vsel %vm528_vm12, %v1345_v50, %v1347_v46 }
 0x318   :  { %v1349_v47 = vpop.permute.xlu1 %1348 }
 0x319   :  { %v1351_v51 = vsel %vm528_vm12, %v1347_v46, %v1349_v47  ;;  %v1439_v54 = vpop.permute.xlu0 %1438 }
 0x31c   :  { %1769 = vmatmul.mubr.msk.f32.vlgmr.msra.gmra.mrb[0].mxu1 %vm98_vm4, %v1766_v48  ;;  %v1437_v52 = vpop.permute.xlu1 %1436 }
 0x31d   :  { %1272 = vmatpush1.msra.mxu1 %v1264_v49  ;;  %1335 = vmatprep.mubr.f32.mxu1 %v1856_v1  ;;  %v1441_v57 = vsel %vm619_vm13, %v1437_v52, %v1439_v54  ;;  %v1529_v58 = vpop.permute.xlu0 %1528 }
 0x31e   :  { %1773 = vmatprep.subr.msk.mxu1 %vm1969_vm8, %v1351_v51 }
 0x320   :  { %v1435_v56 = vpop.permute.xlu1 %1434 }
 0x321   :  { %v1440_v61 = vsel %vm619_vm13, %v1435_v56, %v1437_v52  ;;  %v1527_v63 = vpop.permute.xlu0 %1526 }
 0x322   :  { %v1532_v4 = vsel %vm712_vm14, %v1527_v63, %v1529_v58 }
 0x324   :  { %1771 = vmatmul.mubr.msk.f32.vlgmr.msra.gmra.mrb[0].mxu1 %vm98_vm4, %v1770_v53  ;;  %v1531_v60 = vpop.permute.xlu1 %1530 }
 0x325   :  { %1774 = vmatpush1.msk.msra.mxu1 %vm1986_vm9, %v1350_v55  ;;  %1425 = vmatprep.mubr.f32.mxu1 %v1856_v1  ;;  %v1533_v62 = vsel %vm712_vm14, %v1529_v58, %v1531_v60  ;;  %v1617_v5 = vpop.permute.xlu0 %1616 }
 0x326   :  { %1777 = vmatprep.subr.msk.mxu1 %vm1960_vm5, %v1441_v57 }
 0x328   :  { %v1615_v3 = vpop.permute.xlu1 %1614 }
 0x329   :  { %v1619_v6 = vsel %vm799_vm15, %v1615_v3, %v1617_v5 }
 0x32c   :  { %1775 = vmatmul.mubr.msk.f32.vlgmr.msra.gmra.mrb[0].mxu1 %vm98_vm4, %v1772_v59  ;;  %v1613_v23 = vpop.permute.xlu1 %1612 }
 0x32d   :  { %1778 = vmatpush1.msk.msra.mxu1 %vm1965_vm7, %v1440_v61  ;;  %1515 = vmatprep.mubr.f32.mxu1 %v1856_v1  ;;  %v1618_v8 = vsel %vm799_vm15, %v1613_v23, %v1615_v3 }
 0x32e   :  { %1539 = vmatprep.subr.mxu1 %v1533_v62 }
 0x334   :  { %1779 = vmatmul.mubr.msk.f32.vlgmr.msra.gmra.mrb[0].mxu1 %vm98_vm4, %v1776_v21 }
 0x335   :  { %1540 = vmatpush1.msra.mxu1 %v1532_v4  ;;  %1603 = vmatprep.mubr.f32.mxu1 %v1856_v1 }
 0x336   :  { %1783 = vmatprep.subr.msk.mxu1 %vm1969_vm8, %v1619_v6  ;;  %v1706_v24 = vpop.permute.xlu0 %1705 }
 0x33c   :  { %1781 = vmatmul.mubr.msk.f32.vlgmr.msra.gmra.mrb[0].mxu1 %vm98_vm4, %v1780_v7 }
 0x33d   :  { %1784 = vmatpush1.msk.msra.mxu1 %vm1986_vm9, %v1618_v8  ;;  %1693 = vmatprep.mubr.f32.mxu1 %v1856_v1 }
 0x344   :  { %1785 = vmatmul.mubr.msk.f32.vlgmr.msra.gmra.mrb[0].mxu1 %vm98_vm4, %v1782_v9 }
 0x417   :  { %v1695_v10 = vpop.f32.mrb[0].mxu1 }
 0x418   :  { %v1708_v11 = vadd.f32 %v1706_v24, %v1695_v10  ;;  %v1697_v12 = vpop.f32.mrb[1].mxu1 }
 0x419   :  { %v1709_v13 = vadd.f32 %v1706_v24, %v1697_v12 }
 0x41a   :  { %v1710_v14 = vadd.f32 %v1708_v11, %v1900_v0 }
 0x41b   :  { %v1711_v31 = vadd.f32 %v1709_v13, %v1910_v2 }
 0x41c   :  { %1712 = vst [vmem:[#allocation3] sm:$0xff] %v1710_v14 }
 0x41d   :  { %1713 = vst [vmem:[#allocation3 + $0x8] sm:$0xff] %v1711_v31 }
 0x41e   :  { %1842 = shalt.err (!%p1839_p4)
}
 0x41f   :  { %s1843_s19 = scalar_lea.hbm %s2192_s5, 256 }
 0x420   :  { %p1844_p5 = scmp.ne.s32.totalorder %s2192_s5, %s1843_s19  ;;  %p1847_p6 = scmp.lt.u32.totalorder %s1843_s19, %s2192_s5 }
 0x422   :  { %p1849_p7 = pnand %p1847_p6, %p1844_p5 }
 0x424   :  { %1852 = shalt.err (!%p1849_p7)
}
 0x425   :  { %1723 = dma.vmem_to_hbm [thread:$0]  %s1721_s16, 256, %s2192_s5, [#allocation4]  }
 0x426   :  { %1853 = dma.done.wait [#allocation4], 256  }
 0x427   :  { %1854 = vsyncadd [#allocation4], 4294967040 }
 0x428   :  { %1727 = vsyncpa [#allocation4], 1 }

</bundles_post_ra>
